<compile_context>
chip_gen: v7x
topology: tpu7x:2x2x1
jax: 0.10.0
libtpu: 0.0.40
codegen_flags: <defaults>
</compile_context>

<pallas_src>
import jax
import jax.numpy as jnp
from jax.experimental import pallas as pl
from jax.experimental.pallas import tpu as pltpu

OUT_DIM = 2      # final classifier width
OUT_PAD = 128    # lane-aligned padded width of the final projection


def _pick_tile(dim, cap):
    """Largest tile <= cap that evenly divides `dim` (multiple of 8 unless full)."""
    if dim <= cap:
        return dim
    for t in range(cap, 0, -1):
        if dim % t == 0 and t % 8 == 0:
            return t
    return dim


# ---------------------------------------------------------------------------
# Fused kernel: avg/max pooling + concat + Linear/BN/ReLU/Linear/ReLU/Linear.
# Grid = (batch tiles, channel tiles); channel axis is the K-reduction.
# ---------------------------------------------------------------------------
def _fused_kernel(x_ref, w1a_ref, w1m_ref, b1_ref, s_ref, t_ref,
                  w2_ref, b2_ref, w3_ref, b3_ref, o_ref, acc_ref):
    k = pl.program_id(1)

    @pl.when(k == 0)
    def _init():
        acc_ref[...] = jnp.zeros_like(acc_ref)

    # Global avg / max pooling over the spatial axis of this channel tile.
    x = x_ref[...].astype(jnp.float32)              # [TILE_B, TILE_C, S]
    avg = jnp.mean(x, axis=-1)                      # [TILE_B, TILE_C]  (f32)
    mx = jnp.max(x, axis=-1)                        # [TILE_B, TILE_C]  (f32)

    # First Linear decomposed over the concat + channel tiles:
    #   cat([avg, max], 1) @ W1 == avg @ W1[:C] + max @ W1[C:]
    acc_ref[...] += (
        jnp.dot(avg.astype(jnp.bfloat16), w1a_ref[...],
                preferred_element_type=jnp.float32)
        + jnp.dot(mx.astype(jnp.bfloat16), w1m_ref[...],
                  preferred_element_type=jnp.float32))

    # Rest of the head once all channel tiles have been accumulated.
    @pl.when(k == pl.num_programs(1) - 1)
    def _finalize():
        h1 = acc_ref[...] + b1_ref[...]             # Linear bias
        h1 = h1 * s_ref[...] + t_ref[...]           # folded BatchNorm1d (eval)
        h1 = jnp.maximum(h1, 0.0)                   # ReLU (dropout = identity)
        h2 = jnp.dot(h1.astype(jnp.bfloat16), w2_ref[...],
                     preferred_element_type=jnp.float32) + b2_ref[...]
        h2 = jnp.maximum(h2, 0.0)                   # ReLU (dropout = identity)
        o_ref[...] = (jnp.dot(h2.astype(jnp.bfloat16), w3_ref[...],
                              preferred_element_type=jnp.float32)
                      + b3_ref[...])


def fused_pool_head(feats_bchw, packed):
    (w1a, w1m, b1, bn_s, bn_t, w2, b2, w3p, b3p) = packed
    B, C, H, W = feats_bchw.shape
    S = H * W
    H1 = w1a.shape[1]
    H2 = w2.shape[1]

    x3 = feats_bchw.reshape(B, C, S)                # plain-JAX glue reshape

    tile_c = _pick_tile(C, 256)                     # K tile (channels)
    tile_b = _pick_tile(B, 128)                     # M tile (batch)
    grid = (B // tile_b, C // tile_c)

    flops = 2 * B * C * S + 2 * B * (2 * C * H1 + H1 * H2 + H2 * OUT_PAD)
    bytes_accessed = (x3.size * x3.dtype.itemsize
                      + sum(int(a.size) * a.dtype.itemsize for a in packed)
                      + B * OUT_PAD * 4)

    out = pl.pallas_call(
        _fused_kernel,
        out_shape=jax.ShapeDtypeStruct((B, OUT_PAD), jnp.float32),
        grid_spec=pltpu.PrefetchScalarGridSpec(
            num_scalar_prefetch=0,
            grid=grid,
            in_specs=[
                pl.BlockSpec((tile_b, tile_c, S), lambda b, k: (b, k, 0)),  # x
                pl.BlockSpec((tile_c, H1), lambda b, k: (k, 0)),            # W1 (avg half)
                pl.BlockSpec((tile_c, H1), lambda b, k: (k, 0)),            # W1 (max half)
                pl.BlockSpec((1, H1), lambda b, k: (0, 0)),                 # b1
                pl.BlockSpec((1, H1), lambda b, k: (0, 0)),                 # bn scale
                pl.BlockSpec((1, H1), lambda b, k: (0, 0)),                 # bn shift
                pl.BlockSpec((H1, H2), lambda b, k: (0, 0)),                # W2
                pl.BlockSpec((1, H2), lambda b, k: (0, 0)),                 # b2
                pl.BlockSpec((H2, OUT_PAD), lambda b, k: (0, 0)),           # W3 (padded)
                pl.BlockSpec((1, OUT_PAD), lambda b, k: (0, 0)),            # b3 (padded)
            ],
            out_specs=pl.BlockSpec((tile_b, OUT_PAD), lambda b, k: (b, 0)),
            scratch_shapes=[pltpu.VMEM((tile_b, H1), jnp.float32)],
        ),
        compiler_params=pltpu.CompilerParams(
            dimension_semantics=("parallel", "arbitrary"),
            vmem_limit_bytes=32 * 1024 * 1024,
        ),
        cost_estimate=pl.CostEstimate(
            flops=int(flops), transcendentals=0,
            bytes_accessed=int(bytes_accessed)),
    )(x3, w1a, w1m, b1, bn_s, bn_t, w2, b2, w3p, b3p)

    return out[:, :OUT_DIM]


# ---------------------------------------------------------------------------
# Parameter construction (deterministic, synthetic) + packing for the kernel.
# ---------------------------------------------------------------------------
def make_params(key, num_features):
    """Raw (PyTorch-layout) head parameters; num_features = 2 * C."""
    nf = num_features
    h1 = nf // 2
    h2 = nf // 4
    keys = jax.random.split(key, 8)
    w1 = jax.random.normal(keys[0], (nf, h1), jnp.float32) * 0.05
    b1 = jax.random.normal(keys[1], (1, h1), jnp.float32) * 0.05
    gamma = 1.0 + 0.1 * jax.random.normal(keys[2], (1, h1), jnp.float32)
    beta = 0.1 * jax.random.normal(keys[3], (1, h1), jnp.float32)
    r_mean = 0.05 * jax.random.normal(keys[4], (1, h1), jnp.float32)
    r_var = 1.0 + 0.1 * jnp.abs(jax.random.normal(keys[5], (1, h1), jnp.float32))
    w2 = jax.random.normal(keys[6], (h1, h2), jnp.float32) * 0.05
    b2 = jnp.zeros((1, h2), jnp.float32)
    w3 = jax.random.normal(keys[7], (h2, OUT_DIM), jnp.float32) * 0.05
    b3 = jnp.zeros((1, OUT_DIM), jnp.float32)
    return (w1, b1, gamma, beta, r_mean, r_var, w2, b2, w3, b3)


def pack_params(raw, eps=1e-5):
    """Fold BatchNorm1d running stats, split W1 into avg/max halves, cast MXU
    weights to bf16, and pad the final projection to a lane-aligned width."""
    (w1, b1, gamma, beta, r_mean, r_var, w2, b2, w3, b3) = raw
    c = w1.shape[0] // 2
    bn_scale = gamma / jnp.sqrt(r_var + eps)
    bn_shift = beta - r_mean * bn_scale
    w1a = w1[:c].astype(jnp.bfloat16)        # multiplies the avg-pooled half
    w1m = w1[c:].astype(jnp.bfloat16)        # multiplies the max-pooled half
    w3p = jnp.zeros((w3.shape[0], OUT_PAD), jnp.float32).at[:, :OUT_DIM].set(w3)
    b3p = jnp.zeros((1, OUT_PAD), jnp.float32).at[:, :OUT_DIM].set(b3)
    return (w1a, w1m,
            b1.astype(jnp.float32),
            bn_scale.astype(jnp.float32),
            bn_shift.astype(jnp.float32),
            w2.astype(jnp.bfloat16),
            b2.astype(jnp.float32),
            w3p.astype(jnp.bfloat16),
            b3p.astype(jnp.float32))


@jax.jit
def model_forward(feats_bchw, packed_params):
    # self.net._dropout(x) and the two head Dropouts are identity in eval mode.
    return fused_pool_head(feats_bchw, packed_params)


if __name__ == "__main__":
    key = jax.random.PRNGKey(0)
    k_x, k_p = jax.random.split(key)

    # Small shapes: backbone feature map [B, C, H, W]; num_features = 2*C.
    B, C, H, W = 2, 16, 8, 8
    x = jax.random.normal(k_x, (B, C, H, W), jnp.float32)
    raw = make_params(k_p, num_features=2 * C)
    packed = pack_params(raw)

    out = model_forward(x, packed)
    jax.block_until_ready(out)
    assert out.shape == (B, OUT_DIM) and out.dtype == jnp.float32
    print("KERNEL_OK")
</pallas_src>

<mosaic_0001>
module attributes {stable_mosaic.version = 11 : i64} {
  func.func @_fused_kernel(%arg0: i32, %arg1: i32, %arg2: memref<2x16x64xf32, #tpu.memory_space<vmem>>, %arg3: memref<16x16xbf16, #tpu.memory_space<vmem>>, %arg4: memref<16x16xbf16, #tpu.memory_space<vmem>>, %arg5: memref<1x16xf32, #tpu.memory_space<vmem>>, %arg6: memref<1x16xf32, #tpu.memory_space<vmem>>, %arg7: memref<1x16xf32, #tpu.memory_space<vmem>>, %arg8: memref<16x8xbf16, #tpu.memory_space<vmem>>, %arg9: memref<1x8xf32, #tpu.memory_space<vmem>>, %arg10: memref<8x128xbf16, #tpu.memory_space<vmem>>, %arg11: memref<1x128xf32, #tpu.memory_space<vmem>>, %arg12: memref<2x128xf32, #tpu.memory_space<vmem>>, %arg13: memref<2x16xf32, #tpu.memory_space<vmem>>) attributes {dimension_semantics = [#tpu.dimension_semantics<parallel>, #tpu.dimension_semantics<arbitrary>], iteration_bounds = array<i64: 1, 1>, scalar_prefetch = 0 : i64, scratch_operands = 1 : i64, tpu.core_type = #tpu.core_type<tc>, window_params = [{transform_indices = @transform_0, window_bounds = array<i64: 2, 16, 64>}, {transform_indices = @transform_1, window_bounds = array<i64: 16, 16>}, {transform_indices = @transform_2, window_bounds = array<i64: 16, 16>}, {pipeline_mode = #tpu.pipeline_mode<synchronous>, transform_indices = @transform_3, window_bounds = array<i64: 1, 16>}, {pipeline_mode = #tpu.pipeline_mode<synchronous>, transform_indices = @transform_4, window_bounds = array<i64: 1, 16>}, {pipeline_mode = #tpu.pipeline_mode<synchronous>, transform_indices = @transform_5, window_bounds = array<i64: 1, 16>}, {pipeline_mode = #tpu.pipeline_mode<synchronous>, transform_indices = @transform_6, window_bounds = array<i64: 16, 8>}, {pipeline_mode = #tpu.pipeline_mode<synchronous>, transform_indices = @transform_7, window_bounds = array<i64: 1, 8>}, {pipeline_mode = #tpu.pipeline_mode<synchronous>, transform_indices = @transform_8, window_bounds = array<i64: 8, 128>}, {pipeline_mode = #tpu.pipeline_mode<synchronous>, transform_indices = @transform_9, window_bounds = array<i64: 1, 128>}, {transform_indices = @transform_10, window_bounds = array<i64: 2, 128>}]} {
    %c0_i32 = arith.constant 0 : i32
    %0 = arith.cmpi eq, %arg1, %c0_i32 : i32
    %1 = arith.extui %0 : i1 to i32
    %c0_i32_0 = arith.constant 0 : i32
    %2 = arith.cmpi ne, %1, %c0_i32_0 : i32
    scf.if %2 {
      %cst_17 = arith.constant 0.000000e+00 : f32
      %21 = vector.broadcast %cst_17 : f32 to vector<2x16xf32>
      %c0_18 = arith.constant 0 : index
      %c0_19 = arith.constant 0 : index
      %22 = vector.load %arg13[%c0_18, %c0_19] : memref<2x16xf32, #tpu.memory_space<vmem>>, vector<2x16xf32>
      tpu.vector_store %arg13[%c0_18, %c0_19], %21 {strides = array<i32>} : memref<2x16xf32, #tpu.memory_space<vmem>>, vector<2x16xf32>,
    } else {
    }
    %c0 = arith.constant 0 : index
    %c0_1 = arith.constant 0 : index
    %c0_2 = arith.constant 0 : index
    %3 = vector.load %arg2[%c0, %c0_1, %c0_2] : memref<2x16x64xf32, #tpu.memory_space<vmem>>, vector<2x16x64xf32>
    %cst = arith.constant dense<0.000000e+00> : vector<2x16xf32>
    %4 = vector.multi_reduction <add>, %3, %cst [2] : vector<2x16x64xf32> to vector<2x16xf32>
    %cst_3 = arith.constant 6.400000e+01 : f32
    %5 = vector.broadcast %cst_3 : f32 to vector<2x16xf32>
    %6 = arith.divf %4, %5 : vector<2x16xf32>
    %cst_4 = arith.constant dense<0xFF800000> : vector<2x16xf32>
    %7 = vector.multi_reduction <maximumf>, %3, %cst_4 [2] : vector<2x16x64xf32> to vector<2x16xf32>
    %c0_5 = arith.constant 0 : index
    %c0_6 = arith.constant 0 : index
    %8 = vector.load %arg13[%c0_5, %c0_6] : memref<2x16xf32, #tpu.memory_space<vmem>>, vector<2x16xf32>
    %9 = arith.truncf %6 : vector<2x16xf32> to vector<2x16xbf16>
    %c0_7 = arith.constant 0 : index
    %c0_8 = arith.constant 0 : index
    %10 = vector.load %arg3[%c0_7, %c0_8] : memref<16x16xbf16, #tpu.memory_space<vmem>>, vector<16x16xbf16>
    %cst_9 = arith.constant dense<0.000000e+00> : vector<2x16xf32>
    %11 = tpu.matmul %9, %10, %cst_9 {dimension_numbers = #tpu.dot_dimension_numbers<[1], [0], [0], [1], [0, 0, 1, 1], [], []>} : vector<2x16xbf16>, vector<16x16xbf16>, vector<2x16xf32> -> vector<2x16xf32>
    %12 = arith.truncf %7 : vector<2x16xf32> to vector<2x16xbf16>
    %c0_10 = arith.constant 0 : index
    %c0_11 = arith.constant 0 : index
    %13 = vector.load %arg4[%c0_10, %c0_11] : memref<16x16xbf16, #tpu.memory_space<vmem>>, vector<16x16xbf16>
    %cst_12 = arith.constant dense<0.000000e+00> : vector<2x16xf32>
    %14 = tpu.matmul %12, %13, %cst_12 {dimension_numbers = #tpu.dot_dimension_numbers<[1], [0], [0], [1], [0, 0, 1, 1], [], []>} : vector<2x16xbf16>, vector<16x16xbf16>, vector<2x16xf32> -> vector<2x16xf32>
    %15 = arith.addf %11, %14 : vector<2x16xf32>
    %16 = arith.addf %8, %15 : vector<2x16xf32>
    %c0_13 = arith.constant 0 : index
    %c0_14 = arith.constant 0 : index
    %17 = vector.load %arg13[%c0_13, %c0_14] : memref<2x16xf32, #tpu.memory_space<vmem>>, vector<2x16xf32>
    tpu.vector_store %arg13[%c0_13, %c0_14], %16 {strides = array<i32>} : memref<2x16xf32, #tpu.memory_space<vmem>>, vector<2x16xf32>,
    %c0_i32_15 = arith.constant 0 : i32
    %18 = arith.cmpi eq, %arg1, %c0_i32_15 : i32
    %19 = arith.extui %18 : i1 to i32
    %c0_i32_16 = arith.constant 0 : i32
    %20 = arith.cmpi ne, %19, %c0_i32_16 : i32
    scf.if %20 {
      %c0_17 = arith.constant 0 : index
      %c0_18 = arith.constant 0 : index
      %21 = vector.load %arg13[%c0_17, %c0_18] : memref<2x16xf32, #tpu.memory_space<vmem>>, vector<2x16xf32>
      %c0_19 = arith.constant 0 : index
      %c0_20 = arith.constant 0 : index
      %22 = vector.load %arg5[%c0_19, %c0_20] : memref<1x16xf32, #tpu.memory_space<vmem>>, vector<1x16xf32>
      %23 = vector.broadcast %22 : vector<1x16xf32> to vector<2x16xf32>
      %24 = arith.addf %21, %23 : vector<2x16xf32>
      %c0_21 = arith.constant 0 : index
      %c0_22 = arith.constant 0 : index
      %25 = vector.load %arg6[%c0_21, %c0_22] : memref<1x16xf32, #tpu.memory_space<vmem>>, vector<1x16xf32>
      %26 = vector.broadcast %25 : vector<1x16xf32> to vector<2x16xf32>
      %27 = arith.mulf %24, %26 : vector<2x16xf32>
      %c0_23 = arith.constant 0 : index
      %c0_24 = arith.constant 0 : index
      %28 = vector.load %arg7[%c0_23, %c0_24] : memref<1x16xf32, #tpu.memory_space<vmem>>, vector<1x16xf32>
      %29 = vector.broadcast %28 : vector<1x16xf32> to vector<2x16xf32>
      %30 = arith.addf %27, %29 : vector<2x16xf32>
      %cst_25 = arith.constant 0.000000e+00 : f32
      %31 = vector.broadcast %cst_25 : f32 to vector<2x16xf32>
      %32 = arith.maximumf %30, %31 : vector<2x16xf32>
      %33 = arith.truncf %32 : vector<2x16xf32> to vector<2x16xbf16>
      %c0_26 = arith.constant 0 : index
      %c0_27 = arith.constant 0 : index
      %34 = vector.load %arg8[%c0_26, %c0_27] : memref<16x8xbf16, #tpu.memory_space<vmem>>, vector<16x8xbf16>
      %cst_28 = arith.constant dense<0.000000e+00> : vector<2x8xf32>
      %35 = tpu.matmul %33, %34, %cst_28 {dimension_numbers = #tpu.dot_dimension_numbers<[1], [0], [0], [1], [0, 0, 1, 1], [], []>} : vector<2x16xbf16>, vector<16x8xbf16>, vector<2x8xf32> -> vector<2x8xf32>
      %c0_29 = arith.constant 0 : index
      %c0_30 = arith.constant 0 : index
      %36 = vector.load %arg9[%c0_29, %c0_30] : memref<1x8xf32, #tpu.memory_space<vmem>>, vector<1x8xf32>
      %37 = vector.broadcast %36 : vector<1x8xf32> to vector<2x8xf32>
      %38 = arith.addf %35, %37 : vector<2x8xf32>
      %cst_31 = arith.constant 0.000000e+00 : f32
      %39 = vector.broadcast %cst_31 : f32 to vector<2x8xf32>
      %40 = arith.maximumf %38, %39 : vector<2x8xf32>
      %41 = arith.truncf %40 : vector<2x8xf32> to vector<2x8xbf16>
      %c0_32 = arith.constant 0 : index
      %c0_33 = arith.constant 0 : index
      %42 = vector.load %arg10[%c0_32, %c0_33] : memref<8x128xbf16, #tpu.memory_space<vmem>>, vector<8x128xbf16>
      %cst_34 = arith.constant dense<0.000000e+00> : vector<2x128xf32>
      %43 = tpu.matmul %41, %42, %cst_34 {dimension_numbers = #tpu.dot_dimension_numbers<[1], [0], [0], [1], [0, 0, 1, 1], [], []>} : vector<2x8xbf16>, vector<8x128xbf16>, vector<2x128xf32> -> vector<2x128xf32>
      %c0_35 = arith.constant 0 : index
      %c0_36 = arith.constant 0 : index
      %44 = vector.load %arg11[%c0_35, %c0_36] : memref<1x128xf32, #tpu.memory_space<vmem>>, vector<1x128xf32>
      %45 = vector.broadcast %44 : vector<1x128xf32> to vector<2x128xf32>
      %46 = arith.addf %43, %45 : vector<2x128xf32>
      %c0_37 = arith.constant 0 : index
      %c0_38 = arith.constant 0 : index
      %47 = vector.load %arg12[%c0_37, %c0_38] : memref<2x128xf32, #tpu.memory_space<vmem>>, vector<2x128xf32>
      tpu.vector_store %arg12[%c0_37, %c0_38], %46 {strides = array<i32>} : memref<2x128xf32, #tpu.memory_space<vmem>>, vector<2x128xf32>,
    } else {
    }
    return
  }
  func.func @transform_0(%arg0: i32, %arg1: i32) -> (i32, i32, i32) {
    %c0_i32 = arith.constant 0 : i32
    %c0_i32_0 = arith.constant 0 : i32
    return %arg0, %arg1, %c0_i32 : i32, i32, i32
  }
  func.func @transform_1(%arg0: i32, %arg1: i32) -> (i32, i32) {
    %c0_i32 = arith.constant 0 : i32
    %c0_i32_0 = arith.constant 0 : i32
    return %arg1, %c0_i32 : i32, i32
  }
  func.func @transform_2(%arg0: i32, %arg1: i32) -> (i32, i32) {
    %c0_i32 = arith.constant 0 : i32
    %c0_i32_0 = arith.constant 0 : i32
    return %arg1, %c0_i32 : i32, i32
  }
  func.func @transform_3(%arg0: i32, %arg1: i32) -> (i32, i32) {
    %c0_i32 = arith.constant 0 : i32
    %c0_i32_0 = arith.constant 0 : i32
    %c0_i32_1 = arith.constant 0 : i32
    return %c0_i32, %c0_i32_0 : i32, i32
  }
  func.func @transform_4(%arg0: i32, %arg1: i32) -> (i32, i32) {
    %c0_i32 = arith.constant 0 : i32
    %c0_i32_0 = arith.constant 0 : i32
    %c0_i32_1 = arith.constant 0 : i32
    return %c0_i32, %c0_i32_0 : i32, i32
  }
  func.func @transform_5(%arg0: i32, %arg1: i32) -> (i32, i32) {
    %c0_i32 = arith.constant 0 : i32
    %c0_i32_0 = arith.constant 0 : i32
    %c0_i32_1 = arith.constant 0 : i32
    return %c0_i32, %c0_i32_0 : i32, i32
  }
  func.func @transform_6(%arg0: i32, %arg1: i32) -> (i32, i32) {
    %c0_i32 = arith.constant 0 : i32
    %c0_i32_0 = arith.constant 0 : i32
    %c0_i32_1 = arith.constant 0 : i32
    return %c0_i32, %c0_i32_0 : i32, i32
  }
  func.func @transform_7(%arg0: i32, %arg1: i32) -> (i32, i32) {
    %c0_i32 = arith.constant 0 : i32
    %c0_i32_0 = arith.constant 0 : i32
    %c0_i32_1 = arith.constant 0 : i32
    return %c0_i32, %c0_i32_0 : i32, i32
  }
  func.func @transform_8(%arg0: i32, %arg1: i32) -> (i32, i32) {
    %c0_i32 = arith.constant 0 : i32
    %c0_i32_0 = arith.constant 0 : i32
    %c0_i32_1 = arith.constant 0 : i32
    return %c0_i32, %c0_i32_0 : i32, i32
  }
  func.func @transform_9(%arg0: i32, %arg1: i32) -> (i32, i32) {
    %c0_i32 = arith.constant 0 : i32
    %c0_i32_0 = arith.constant 0 : i32
    %c0_i32_1 = arith.constant 0 : i32
    return %c0_i32, %c0_i32_0 : i32, i32
  }
  func.func @transform_10(%arg0: i32, %arg1: i32) -> (i32, i32) {
    %c0_i32 = arith.constant 0 : i32
    %c0_i32_0 = arith.constant 0 : i32
    return %arg0, %c0_i32 : i32, i32
  }
}

</mosaic_0001>

<bundles_post_ra>
// kernel: model_forward.1
= control target key start
LH: loop header
LB: loop body
LE: loop exit
PB: predicated region body
PF: predicated region fallthrough
CT: control target
= control target key end

     0   :  { %vm47_vm0 = vcmask 523264   ;;  %s621_s0 = inlined_call_operand.vmem [shape: f32[2,16,64], index: 0, kind: input, shape index: {}]   ;;  %s622_s1 = inlined_call_operand.vmem [shape: bf16[16,16], index: 1, kind: input, shape index: {}]   ;;  %s623_s2 = inlined_call_operand.vmem [shape: bf16[16,16], index: 2, kind: input, shape index: {}]   ;;  %s624_s3 = inlined_call_operand.vmem [shape: f32[1,16], index: 3, kind: input, shape index: {}]   ;;  %s625_s4 = inlined_call_operand.vmem [shape: f32[1,16], index: 4, kind: input, shape index: {}]   ;;  %s626_s5 = inlined_call_operand.vmem [shape: f32[1,16], index: 5, kind: input, shape index: {}]   ;;  %s627_s6 = inlined_call_operand.vmem [shape: bf16[16,8], index: 6, kind: input, shape index: {}]   ;;  %s628_s7 = inlined_call_operand.vmem [shape: f32[1,8], index: 7, kind: input, shape index: {}]   ;;  %s629_s8 = inlined_call_operand.vmem [shape: bf16[8,128], index: 8, kind: input, shape index: {}]   ;;  %s630_s9 = inlined_call_operand.vmem [shape: f32[1,128], index: 9, kind: input, shape index: {}]   ;;  %s631_s10 = inlined_call_operand.hbm [shape: f32[2,128], index: 10, kind: output, shape index: {}]  }
   0x1   :  { %v45_v0 = vld [vmem:[%s621_s0 + $0x10] sm:$0xff]  ;;  %v43_v1 = vld [vmem:[%s621_s0] sm:$0xff]  ;;  %v46_v2 = vld [vmem:[%s621_s0 + $0x18] sm:$0xff] }
   0x2   :  { %v54_v3 = vsel %vm47_vm0, %v45_v0, 0.0  ;;  %v48_v4 = vsel %vm47_vm0, %v43_v1, 0.0  ;;  %v44_v5 = vld [vmem:[%s621_s0 + $0x8] sm:$0xff]  ;;  %v57_v6 = vsel %vm47_vm0, %v46_v2, 0.0 }
   0x3   :  { %55 = vadd.xlane.f32.xlu1 %v54_v3  ;;  %49 = vadd.xlane.f32.xlu0 %v48_v4  ;;  %v51_v7 = vsel %vm47_vm0, %v44_v5, 0.0 }
   0x4   :  { %15 = vsyncpa [#allocation4], 0  ;;  %v68_v8 = vsel %vm47_vm0, %v44_v5, -inf  ;;  %v65_v9 = vsel %vm47_vm0, %v43_v1, -inf  ;;  %v74_v10 = vsel %vm47_vm0, %v46_v2, -inf  ;;  %v71_v11 = vsel %vm47_vm0, %v45_v0, -inf }
   0x5   :  { %v453_v12 = vld [vmem:[%s622_s1] sm:$0xff]   ;;  %v480_v13 = vmov 0.0   ;;  %vm481_vm1 = vmmov 0   ;;  %v92_v15 = vlaneseq  ;;  %vm103_vm2 = vcmask 130112  }
   0x6   :  { %432 = vmatprep.subr.bf16.mxu1 %v480_v13  ;;  %426 = vmatprep.subr.bf16.mxu0 %v480_v13  ;;  %v454_v14 = vld [vmem:[%s623_s2] sm:$0xff]   ;;  %vm114_vm3 = vcmask 1041409   ;;  %vm123_vm4 = vcmask 130048   ;;  %vm41_vm5 = vcmask 123904   ;;  %vm347_vm6 = vcmask 1043456  }
   0x7   :  { %58 = vadd.xlane.f32.xlu1 %v57_v6  ;;  %52 = vadd.xlane.f32.xlu0 %v51_v7  ;;  %v93_v16 = vand.u32 127, %v92_v15  ;;  %v95_v19 = vshrl.u32 %v92_v15, 7  ;;  %42 = vst.msk [vmem:[#allocation2] sm:$0x3] %vm41_vm5, %v480_v13  ;;  %v455_v61 = vld [vmem:[%s627_s6] sm:$0xff]   ;;  %vm343_vm7 = vcmask 64512  }
   0x8   :  { %433 = vmatpush3.bf16.msra.mxu1 %v453_v12  ;;  %434 = vmatprep.mubr.msk.bf16.mxu1 %vm481_vm1, %v480_v13  ;;  %v335_v62 = vld [vmem:[%s629_s8] sm:$0xf] }
   0x9   :  { %444 = vmatprep.subr.bf16.mxu1 %v480_v13  ;;  %428 = vmatprep.mubr.msk.bf16.mxu0 %vm481_vm1, %v480_v13  ;;  %v98_v20 = vadd.s32 4294967288, %v93_v16  ;;  %v96_v27 = vsub.s32 %v93_v16, %v95_v19  ;;  %v349_v63 = vsel %vm347_vm6, %v335_v62, 0  ;;  %v412_v15 = vld [vmem:[%s626_s5] ss:$0 sm:$0xff]  ;;  %s482_s5 = smov [#allocation3]  }
   0xa   :  { %427 = vmatpush3.bf16.msra.mxu0 %v454_v14  ;;  %s398_s12 = sshll.u32 %s482_s5, 4  ;;  %s399_s12 = int_to_ptr.vmem [resolvable:$true] %s398_s12 }
   0xb   :  { %69 = vmax.xlane.f32.xlu1 %v68_v8  ;;  %66 = vmax.xlane.f32.xlu0 %v65_v9  ;;  %v101_v28 = vsub.s32 %v98_v20, %v95_v19  ;;  %v413_v20 = vld [vmem:[%s628_s7] ss:$0 sm:$0xff]  ;;  %s456_s7 = scalar_lea.vmem %s399_s12, 32  ;;  %p461_p1 = scmp.lt.s32.totalorder %s399_s12, %s399_s12 }
   0xc   :  { %438 = vmatprep.subr.bf16.mxu0 %v480_v13  ;;  %p457_p0 = scmp.ne.s32.totalorder %s399_s12, %s456_s7  ;;  %p462_p2 = scmp.lt.s32.totalorder %s456_s7, %s456_s7 }
   0xe   :  { %v77_v4 = vld [vmem:[#allocation2] sm:$0x3]  ;;  %p463_p3 = por %p462_p2, %p461_p1 }
   0xf   :  { %75 = vmax.xlane.f32.xlu1 %v74_v10  ;;  %72 = vmax.xlane.f32.xlu0 %v71_v11  ;;  %v410_v11 = vld [vmem:[%s624_s3] ss:$0 sm:$0xff] }
  0x10   :  { %p464_p4 = pnand %p463_p3, %p457_p0 }
  0x90   :  { %v56_v17 = vpop.xlane.xlu1 %55  ;;  %v50_v18 = vpop.xlane.xlu0 %49 }
  0x91   :  { %v63_v23 = vmul.f32 0.015625, %v56_v17  ;;  %v61_v24 = vmul.f32 0.015625, %v50_v18 }
  0x94   :  { %v59_v21 = vpop.xlane.xlu1 %58  ;;  %v53_v22 = vpop.xlane.xlu0 %52 }
  0x95   :  { %v64_v25 = vmul.f32 0.015625, %v59_v21  ;;  %v62_v26 = vmul.f32 0.015625, %v53_v22 }
  0x97   :  { %v79_v29 = vpack.c.bf16 %v64_v25, %v63_v23  ;;  %v78_v30 = vpack.c.bf16 %v62_v26, %v61_v24 }
  0x98   :  { %v70_v31 = vpop.xlane.xlu1 %69  ;;  %v67_v32 = vpop.xlane.xlu0 %66 }
  0x99   :  { %v171_v33 = vunpack.c.l.b16 %v79_v29  ;;  %v172_v34 = vunpack.c.h.b16 %v79_v29  ;;  %v169_v35 = vunpack.c.l.b16 %v78_v30  ;;  %v170_v36 = vunpack.c.h.b16 %v78_v30 }
  0x9a   :  { %v82_v37 = vpack.c.bf16 %v70_v31, %v67_v32 }
  0x9b   :  { %v185_v38 = vrot.slane %v171_v33, %v96_v27  ;;  %v189_v39 = vrot.slane %v172_v34, %v101_v28  ;;  %v176_v40 = vrot.slane %v169_v35, %v96_v27  ;;  %v180_v41 = vrot.slane %v170_v36, %v101_v28 }
  0x9c   :  { %v88_v42 = vunpack.c.l.b16 %v82_v37  ;;  %v89_v43 = vunpack.c.h.b16 %v82_v37  ;;  %v76_v44 = vpop.xlane.xlu1 %75  ;;  %v73_v45 = vpop.xlane.xlu0 %72 }
  0x9d   :  { %v83_v46 = vpack.c.bf16 %v76_v44, %v73_v45  ;;  %v181_v47 = vsel %vm103_vm2, %v180_v41, %v176_v40  ;;  %v190_v48 = vsel %vm103_vm2, %v189_v39, %v185_v38 }
  0x9e   :  { %v97_v49 = vrot.slane %v88_v42, %v96_v27  ;;  %v191_v50 = vsel %vm114_vm3, %v190_v48, %v181_v47  ;;  %v102_v51 = vrot.slane %v89_v43, %v101_v28 }
  0x9f   :  { %v90_v52 = vunpack.c.l.b16 %v83_v46  ;;  %v91_v53 = vunpack.c.h.b16 %v83_v46  ;;  %v192_v54 = vpack.c.b16 %v191_v50, %v191_v50 }
  0xa0   :  { %v104_v57 = vsel %vm103_vm2, %v102_v51, %v97_v49 }
  0xa1   :  { %v108_v55 = vrot.slane %v90_v52, %v96_v27  ;;  %v112_v56 = vrot.slane %v91_v53, %v101_v28  ;;  %435 = vmatmul.mubr.msk.bf16.vlgmr.msra.gmra.mrb[0].mxu1 %vm123_vm4, %v192_v54  ;;  %v416_v28 = vld [vmem:[%s630_s9] ss:$0 sm:$0xff] }
  0xa2   :  { %446 = vmatprep.mubr.msk.bf16.mxu1 %vm481_vm1, %v480_v13  ;;  %445 = vmatpush3.bf16.msra.mxu1 %v349_v63 }
  0xa3   :  { %v113_v58 = vsel %vm103_vm2, %v112_v56, %v108_v55 }
  0xa4   :  { %v115_v59 = vsel %vm114_vm3, %v113_v58, %v104_v57 }
  0xa5   :  { %v116_v60 = vpack.c.b16 %v115_v59, %v115_v59 }
  0xa7   :  { %429 = vmatmul.mubr.msk.bf16.vlgmr.msra.gmra.mrb[0].mxu0 %vm123_vm4, %v116_v60 }
  0xa8   :  { %440 = vmatprep.mubr.msk.bf16.mxu0 %vm481_vm1, %v480_v13  ;;  %439 = vmatpush3.bf16.msra.mxu0 %v455_v61  ;;  %v411_v13 = vld [vmem:[%s625_s4] ss:$0 sm:$0xff] }
 0x174   :  { %v236_v0 = vpop.f32.mrb[0].mxu1 }
 0x175   :  { %v436_v1 = vpop.f32.mrb[1].mxu1 }
 0x176   :  { %v239_v2 = vpop.f32.mrb[2].mxu1 }
 0x177   :  { %v437_v3 = vpop.f32.mrb[3].mxu1 }
 0x17a   :  { %v161_v5 = vpop.f32.mrb[0].mxu0 }
 0x17b   :  { %v237_v6 = vadd.f32 %v236_v0, %v161_v5  ;;  %v430_v7 = vpop.f32.mrb[1].mxu0 }
 0x17c   :  { %v164_v8 = vpop.f32.mrb[2].mxu0 }
 0x17d   :  { %v242_v9 = vadd.f32 %v237_v6, %v77_v4  ;;  %v431_v10 = vpop.f32.mrb[3].mxu0 }
 0x17f   :  { %244 = vst.msk [vmem:[#allocation2] sm:$0x3] %vm41_vm5, %v242_v9 }
 0x186   :  { %v248_v12 = vld [vmem:[#allocation2] sm:$0x3] }
 0x187   :  { %v256_v14 = vadd.f32 %v410_v11, %v248_v12 }
 0x189   :  { %v264_v16 = vmul.f32 %v411_v13, %v256_v14 }
 0x18b   :  { %v272_v17 = vadd.f32 %v412_v15, %v264_v16 }
 0x18d   :  { %v273_v18 = vmax.f32 %v272_v17, 0.0 }
 0x18f   :  { %v274_v19 = vpack.c.bf16 %v273_v18, %v273_v18 }
 0x191   :  { %441 = vmatmul.mubr.msk.bf16.vlgmr.msra.gmra.mrb[4].mxu0 %vm123_vm4, %v274_v19 }
 0x264   :  { %v327_v21 = vpop.f32.mrb[4].mxu0 }
 0x265   :  { %v328_v22 = vadd.f32 %v413_v20, %v327_v21  ;;  %v442_v23 = vpop.f32.mrb[5].mxu0 }
 0x266   :  { %v330_v24 = vpop.f32.mrb[6].mxu0 }
 0x267   :  { %v333_v25 = vmax.f32 %v328_v22, 0.0  ;;  %v443_v26 = vpop.f32.mrb[7].mxu0 }
 0x269   :  { %v334_v27 = vpack.c.bf16 %v333_v25, %v333_v25 }
 0x26b   :  { %447 = vmatmul.mubr.msk.bf16.vlgmr.msra.gmra.mrb[4].mxu1 %vm343_vm7, %v334_v27 }
 0x33e   :  { %v385_v29 = vpop.f32.mrb[4].mxu1 }
 0x33f   :  { %v386_v30 = vadd.f32 %v416_v28, %v385_v29  ;;  %v448_v31 = vpop.f32.mrb[5].mxu1 }
 0x340   :  { %v388_v32 = vpop.f32.mrb[6].mxu1 }
 0x341   :  { %391 = vst [vmem:[#allocation3] sm:$0x3] %v386_v30  ;;  %v449_v33 = vpop.f32.mrb[7].mxu1 }
 0x342   :  { %467 = shalt.err (!%p464_p4)
}
 0x343   :  { %s468_s9 = scalar_lea.hbm %s631_s10, 32 }
 0x344   :  { %p469_p5 = scmp.ne.s32.totalorder %s631_s10, %s468_s9  ;;  %p472_p6 = scmp.lt.u32.totalorder %s468_s9, %s631_s10 }
 0x346   :  { %p474_p7 = pnand %p472_p6, %p469_p5 }
 0x348   :  { %477 = shalt.err (!%p474_p7)
}
 0x349   :  { %401 = dma.vmem_to_hbm [thread:$0]  %s399_s12, 32, %s631_s10, [#allocation4]  }
 0x34a   :  { %478 = dma.done.wait [#allocation4], 32  }
 0x34b   :  { %479 = vsyncadd [#allocation4], 4294967264 }
 0x34c   :  { %405 = vsyncpa [#allocation4], 1 }

</bundles_post_ra>
